<compile_context>
chip_gen: v7x
topology: tpu7x:2x2x1
jax: 0.10.0
libtpu: 0.0.40
codegen_flags: <defaults>
</compile_context>

<pallas_src>
import functools

import numpy as np
import jax
import jax.numpy as jnp
from jax import lax
from jax.experimental import pallas as pl
from jax.experimental.pallas import tpu as pltpu


def _round_up(x, m):
    return ((x + m - 1) // m) * m


def _choose_tile(M, cap=512):
    """Token-tile size: multiple of 8, capped (v7x VMEM budget), >=2 blocks when possible."""
    half = _round_up(max((M + 1) // 2, 1), 8)
    return max(8, min(cap, half))


# ----------------------------------------------------------------------------
# Pallas kernels
# ----------------------------------------------------------------------------
def acq_kernel(x_ref, w1_ref, b1_ref, w2row_ref, b2_ref, out_ref):
    """AcquisitionHead, whole problem in one grid point.

    x_ref:     [B, Nq, E]   w1_ref: [E, H]   b1_ref: [1, H]
    w2row_ref: [1, H]       b2_ref: [1, 1]   out_ref: [B, Nq]
    """
    x = x_ref[...]                                                   # [B, Nq, E]
    h = jnp.maximum(
        jnp.einsum('bne,eh->bnh', x, w1_ref[...],
                   preferred_element_type=jnp.float32) + b1_ref[...], 0.0)  # [B, Nq, H]
    logits = jnp.sum(h * w2row_ref[...], axis=-1) + b2_ref[...]      # [B, Nq] (Nq on lanes)
    m = jnp.max(logits, axis=-1, keepdims=True)                      # softmax over query tokens
    e = jnp.exp(logits - m)
    out_ref[...] = e / jnp.sum(e, axis=-1, keepdims=True)            # [B, Nq]


def gmm_kernel(x_ref, w1_ref, b1_ref, w2_ref, b2_ref, out_ref, *, dyK, std_min):
    """All K GMM heads fused into one 2-layer MLP + masked GMM epilogue.

    x_ref: [TM, E], w1_ref: [E, K*H], b1_ref: [1, K*H]
    w2_ref: [K*H, C_pad] (block-diag, columns in torch chunk order, zero-padded)
    b2_ref: [1, C_pad]
    out_ref: [TM, C_pad] lane-dense slab:
        cols [0, dyK)       -> raw means
        cols [dyK, 2*dyK)   -> softplus(raw) + std_min
        cols [2*dyK, 3*dyK) -> softmax over the dyK mixture-weight columns
        cols [3*dyK, C_pad) -> zeros (padding)
    """
    x = x_ref[...]
    h = jnp.maximum(
        jnp.dot(x, w1_ref[...], preferred_element_type=jnp.float32)
        + b1_ref[...], 0.0)                                          # [TM, K*H]
    o = jnp.dot(h, w2_ref[...], preferred_element_type=jnp.float32) + b2_ref[...]  # [TM, C_pad]

    TM, C = o.shape
    col = lax.broadcasted_iota(jnp.int32, (TM, C), 1)
    mean_mask = col < dyK
    std_mask = (col >= dyK) & (col < 2 * dyK)
    wt_mask = (col >= 2 * dyK) & (col < 3 * dyK)

    # softplus(x) = max(x,0) + log(1 + exp(-|x|))  (computed lane-dense, masked after)
    sp = jnp.maximum(o, 0.0) + jnp.log(1.0 + jnp.exp(-jnp.abs(o))) + std_min

    # masked softmax over the mixture-weight columns (per row)
    ow = jnp.where(wt_mask, o, -jnp.inf)
    mw = jnp.max(ow, axis=-1, keepdims=True)
    e = jnp.exp(ow - mw)                                             # 0 outside the mask
    wt = e * pl.reciprocal(jnp.sum(e, axis=-1, keepdims=True), approx=False)

    out_ref[...] = (jnp.where(mean_mask, o, 0.0)
                    + jnp.where(std_mask, sp, 0.0)
                    + wt)


# ----------------------------------------------------------------------------
# Wrappers (glue)
# ----------------------------------------------------------------------------
def acquisition_forward(p, z_query):
    B, Nq, E = z_query.shape
    H = p["w1"].shape[1]
    return pl.pallas_call(
        acq_kernel,
        grid=(1,),
        in_specs=[
            pl.BlockSpec((B, Nq, E), lambda i: (0, 0, 0)),
            pl.BlockSpec((E, H), lambda i: (0, 0)),
            pl.BlockSpec((1, H), lambda i: (0, 0)),
            pl.BlockSpec((1, H), lambda i: (0, 0)),
            pl.BlockSpec((1, 1), lambda i: (0, 0)),
        ],
        out_specs=pl.BlockSpec((B, Nq), lambda i: (0, 0)),
        out_shape=jax.ShapeDtypeStruct((B, Nq), jnp.float32),
        compiler_params=pltpu.CompilerParams(dimension_semantics=("arbitrary",)),
    )(z_query, p["w1"], p["b1"], p["w2row"], p["b2"])                 # [B, Nq]


def gmm_forward(p, z, std_min):
    """One fused-GMM pass over all tokens of z (shape [B, n, E])."""
    B, n, E = z.shape
    M = B * n
    x = z.reshape(M, E)

    KH = p["w1_big"].shape[1]
    C_pad = p["w2_big"].shape[1]
    dyK = p["dyK"]

    TM = _choose_tile(M)
    M_pad = _round_up(M, TM)
    if M_pad != M:
        x = jnp.pad(x, ((0, M_pad - M), (0, 0)))

    kernel = functools.partial(gmm_kernel, dyK=dyK, std_min=std_min)
    slab = pl.pallas_call(
        kernel,
        grid=(M_pad // TM,),
        in_specs=[
            pl.BlockSpec((TM, E), lambda i: (i, 0)),
            pl.BlockSpec((E, KH), lambda i: (0, 0)),
            pl.BlockSpec((1, KH), lambda i: (0, 0)),
            pl.BlockSpec((KH, C_pad), lambda i: (0, 0)),
            pl.BlockSpec((1, C_pad), lambda i: (0, 0)),
        ],
        out_specs=pl.BlockSpec((TM, C_pad), lambda i: (i, 0)),
        out_shape=jax.ShapeDtypeStruct((M_pad, C_pad), jnp.float32),
        compiler_params=pltpu.CompilerParams(dimension_semantics=("parallel",)),
    )(x, p["w1_big"], p["b1_big"], p["w2_big"], p["b2_big"])

    slab = slab[:M]
    return {
        "mixture_means": slab[:, 0:dyK].reshape(B, n, dyK),
        "mixture_stds": slab[:, dyK:2 * dyK].reshape(B, n, dyK),
        "mixture_weights": slab[:, 2 * dyK:3 * dyK].reshape(B, n, dyK),
    }


def output_head_forward(params, batch, z):
    """Eval-mode OutputHead.forward (time_token=False, single_head=False)."""
    n_context = batch["context_x"].shape[1]
    n_query = batch["query_x"].shape[1]
    z_query = z[:, n_context:n_context + n_query]
    z_qt = z[:, n_context:]                       # query + target (contiguous slab)

    zt = acquisition_forward(params["acq"], z_query)                 # [B, Nq]

    # eval path of torch: values, idx = max(zt, -1); log_prob = log(values)
    # TODO(synk): training-mode Categorical sampling (torch.distributions) not implemented.
    log_prob = jnp.log(jnp.max(zt, axis=-1))                         # [B]
    idx_next = jnp.argmax(zt, axis=-1)[:, None]                      # [B, 1]

    # Single GMM pass over query+target tokens (shared weights), split afterwards.
    gmm_all = gmm_forward(params["gmm"], z_qt, params["std_min"])
    posterior_out_query = {k: v[:, :n_query] for k, v in gmm_all.items()}
    posterior_out = {k: v[:, n_query:] for k, v in gmm_all.items()}

    return {
        "posterior_out_query": posterior_out_query,
        "posterior_out": posterior_out,
        "design_out": {"idx": idx_next, "log_prob": log_prob, "zt": zt},
    }


# ----------------------------------------------------------------------------
# Deterministic parameter construction (mimics nn.Linear default init shapes)
# ----------------------------------------------------------------------------
def linear_init(key, fan_in, fan_out):
    kw, kb = jax.random.split(key)
    bound = 1.0 / np.sqrt(fan_in)
    w = jax.random.uniform(kw, (fan_in, fan_out), jnp.float32, -bound, bound)
    b = jax.random.uniform(kb, (fan_out,), jnp.float32, -bound, bound)
    return w, b


def make_params(key, dim_embedding, dim_feedforward, dim_y, num_components, std_min):
    E, H, dy, K = dim_embedding, dim_feedforward, dim_y, num_components
    keys = jax.random.split(key, 2 + 2 * K)

    # --- acquisition head: Linear(E,H) -> ReLU -> Linear(H,1) ---
    aw1, ab1 = linear_init(keys[0], E, H)
    aw2, ab2 = linear_init(keys[1], H, 1)
    acq = {
        "w1": aw1,
        "b1": ab1.reshape(1, H),
        "w2row": aw2.T,                 # [1, H]
        "b2": ab2.reshape(1, 1),
    }
    acq_raw = (aw1, ab1, aw2, ab2)

    # --- GMM heads: K x (Linear(E,H) -> ReLU -> Linear(H, 3*dy)) ---
    heads_raw = []
    for k in range(K):
        w1, b1 = linear_init(keys[2 + 2 * k], E, H)
        w2, b2 = linear_init(keys[3 + 2 * k], H, 3 * dy)
        heads_raw.append((w1, b1, w2, b2))

    # Pack into one fused MLP.  Column order of W2_big reproduces torch's
    # stack -> movedim(0,-1) -> flatten(-2,-1) -> chunk(3): column index = d*K + k.
    # Columns are zero-padded up to a multiple of 128 so the kernel output is a
    # single lane-dense slab (unmasked stores).
    C = 3 * dy * K
    C_pad = _round_up(C, 128)
    W1_big = np.concatenate([np.asarray(h[0]) for h in heads_raw], axis=1)     # [E, K*H]
    b1_big = np.concatenate([np.asarray(h[1]) for h in heads_raw], axis=0)     # [K*H]
    W2_big = np.zeros((K * H, C_pad), np.float32)
    b2_big = np.zeros((C_pad,), np.float32)
    for k in range(K):
        w2_k = np.asarray(heads_raw[k][2])   # [H, 3*dy]
        b2_k = np.asarray(heads_raw[k][3])   # [3*dy]
        for d in range(3 * dy):
            W2_big[k * H:(k + 1) * H, d * K + k] = w2_k[:, d]
            b2_big[d * K + k] = b2_k[d]

    gmm = {
        "w1_big": jnp.asarray(W1_big),
        "b1_big": jnp.asarray(b1_big).reshape(1, K * H),
        "w2_big": jnp.asarray(W2_big),
        "b2_big": jnp.asarray(b2_big).reshape(1, C_pad),
        "dyK": dy * K,
    }
    params = {"acq": acq, "gmm": gmm, "std_min": std_min}
    raw = {"acq": acq_raw, "gmm_heads": heads_raw}
    return params, raw


# ----------------------------------------------------------------------------
# Pure-JAX reference (mirrors the torch math directly) for a sanity check
# ----------------------------------------------------------------------------
def reference_forward(raw, batch, z, std_min):
    nc = batch["context_x"].shape[1]
    nq = batch["query_x"].shape[1]
    z_query = z[:, nc:nc + nq]
    z_target = z[:, nc + nq:]

    aw1, ab1, aw2, ab2 = raw["acq"]
    logits = jnp.maximum(z_query @ aw1 + ab1, 0.0) @ aw2 + ab2       # [B, Nq, 1]
    zt = jax.nn.softmax(logits[..., 0], axis=-1)

    def gmm_ref(x):
        outs = [jnp.maximum(x @ w1 + b1, 0.0) @ w2 + b2
                for (w1, b1, w2, b2) in raw["gmm_heads"]]            # each [B, n, 3*dy]
        conc = jnp.stack(outs, axis=-1)                              # [B, n, 3*dy, K]
        conc = conc.reshape(*conc.shape[:-2], -1)                    # [B, n, 3*dy*K]
        raw_mean, raw_std, raw_wt = jnp.split(conc, 3, axis=-1)
        return {
            "mixture_means": raw_mean,
            "mixture_stds": jax.nn.softplus(raw_std) + std_min,
            "mixture_weights": jax.nn.softmax(raw_wt, axis=-1),
        }

    return {
        "zt": zt,
        "posterior_out": gmm_ref(z_target),
        "posterior_out_query": gmm_ref(z_query),
    }


# ----------------------------------------------------------------------------
if __name__ == "__main__":
    # small shapes consistent with the module
    B, dim_x, dim_y = 2, 3, 1
    n_context, n_query, n_target = 4, 8, 8
    dim_embedding, dim_feedforward, num_components = 32, 64, 10
    std_min = 1e-4
    N = n_context + n_query + n_target

    key = jax.random.PRNGKey(0)
    kp, kz, kc, kq, kt = jax.random.split(key, 5)

    params, raw = make_params(kp, dim_embedding, dim_feedforward,
                              dim_y, num_components, std_min)

    z = jax.random.normal(kz, (B, N, dim_embedding), jnp.float32)
    batch = {
        "context_x": jax.random.normal(kc, (B, n_context, dim_x), jnp.float32),
        "query_x": jax.random.normal(kq, (B, n_query, dim_x), jnp.float32),
        "target_x": jax.random.normal(kt, (B, n_target, dim_x), jnp.float32),
    }

    outs = output_head_forward(params, batch, z)
    outs = jax.block_until_ready(outs)

    # sanity check against the pure-JAX reference
    ref = reference_forward(raw, batch, z, std_min)
    np.testing.assert_allclose(outs["design_out"]["zt"], ref["zt"],
                               rtol=2e-3, atol=2e-5)
    for name in ("posterior_out", "posterior_out_query"):
        for field in ("mixture_means", "mixture_stds", "mixture_weights"):
            np.testing.assert_allclose(outs[name][field], ref[name][field],
                                       rtol=2e-3, atol=2e-5)
    assert outs["design_out"]["idx"].shape == (B, 1)
    assert outs["design_out"]["log_prob"].shape == (B,)
    assert outs["design_out"]["zt"].shape == (B, n_query)
    assert outs["posterior_out"]["mixture_means"].shape == (B, n_target, dim_y * num_components)
    assert outs["posterior_out_query"]["mixture_weights"].shape == (B, n_query, dim_y * num_components)

    print("KERNEL_OK")
</pallas_src>

<mosaic_0001>
module attributes {stable_mosaic.version = 11 : i64} {
  func.func @acq_kernel(%arg0: i32, %arg1: memref<2x8x32xf32, #tpu.memory_space<vmem>>, %arg2: memref<32x64xf32, #tpu.memory_space<vmem>>, %arg3: memref<1x64xf32, #tpu.memory_space<vmem>>, %arg4: memref<1x64xf32, #tpu.memory_space<vmem>>, %arg5: memref<1x1xf32, #tpu.memory_space<vmem>>, %arg6: memref<2x8xf32, #tpu.memory_space<vmem>>) attributes {dimension_semantics = [#tpu.dimension_semantics<arbitrary>], iteration_bounds = array<i64: 1>, scalar_prefetch = 0 : i64, scratch_operands = 0 : i64, tpu.core_type = #tpu.core_type<tc>, window_params = [{pipeline_mode = #tpu.pipeline_mode<synchronous>, transform_indices = @transform_0, window_bounds = array<i64: 2, 8, 32>}, {pipeline_mode = #tpu.pipeline_mode<synchronous>, transform_indices = @transform_1, window_bounds = array<i64: 32, 64>}, {pipeline_mode = #tpu.pipeline_mode<synchronous>, transform_indices = @transform_2, window_bounds = array<i64: 1, 64>}, {pipeline_mode = #tpu.pipeline_mode<synchronous>, transform_indices = @transform_3, window_bounds = array<i64: 1, 64>}, {pipeline_mode = #tpu.pipeline_mode<synchronous>, transform_indices = @transform_4, window_bounds = array<i64: 1, 1>}, {pipeline_mode = #tpu.pipeline_mode<synchronous>, transform_indices = @transform_5, window_bounds = array<i64: 2, 8>}]} {
    %c0 = arith.constant 0 : index
    %c0_0 = arith.constant 0 : index
    %c0_1 = arith.constant 0 : index
    %0 = vector.load %arg1[%c0, %c0_0, %c0_1] : memref<2x8x32xf32, #tpu.memory_space<vmem>>, vector<2x8x32xf32>
    %c0_2 = arith.constant 0 : index
    %c0_3 = arith.constant 0 : index
    %1 = vector.load %arg2[%c0_2, %c0_3] : memref<32x64xf32, #tpu.memory_space<vmem>>, vector<32x64xf32>
    "tpu.trace_start"() <{level = 10 : i32, message = "bne,eh->bnh"}> : () -> ()
    %cst = arith.constant dense<0.000000e+00> : vector<2x8x64xf32>
    %2 = tpu.matmul %0, %1, %cst {dimension_numbers = #tpu.dot_dimension_numbers<[2], [0], [0, 1], [1], [0, 0, 0, 1, 1, 1], [], []>} : vector<2x8x32xf32>, vector<32x64xf32>, vector<2x8x64xf32> -> vector<2x8x64xf32>
    "tpu.trace_stop"() : () -> ()
    %c0_4 = arith.constant 0 : index
    %c0_5 = arith.constant 0 : index
    %3 = vector.load %arg3[%c0_4, %c0_5] : memref<1x64xf32, #tpu.memory_space<vmem>>, vector<1x64xf32>
    %4 = vector.shape_cast %3 : vector<1x64xf32> to vector<1x1x64xf32>
    %5 = vector.broadcast %4 : vector<1x1x64xf32> to vector<2x8x64xf32>
    %6 = arith.addf %2, %5 : vector<2x8x64xf32>
    %cst_6 = arith.constant 0.000000e+00 : f32
    %7 = vector.broadcast %cst_6 : f32 to vector<2x8x64xf32>
    %8 = arith.maximumf %6, %7 : vector<2x8x64xf32>
    %c0_7 = arith.constant 0 : index
    %c0_8 = arith.constant 0 : index
    %9 = vector.load %arg4[%c0_7, %c0_8] : memref<1x64xf32, #tpu.memory_space<vmem>>, vector<1x64xf32>
    %10 = vector.shape_cast %9 : vector<1x64xf32> to vector<1x1x64xf32>
    %11 = vector.broadcast %10 : vector<1x1x64xf32> to vector<2x8x64xf32>
    %12 = arith.mulf %8, %11 : vector<2x8x64xf32>
    %cst_9 = arith.constant dense<0.000000e+00> : vector<2x8xf32>
    %13 = vector.multi_reduction <add>, %12, %cst_9 [2] : vector<2x8x64xf32> to vector<2x8xf32>
    %c0_10 = arith.constant 0 : index
    %c0_11 = arith.constant 0 : index
    %14 = vector.load %arg5[%c0_10, %c0_11] : memref<1x1xf32, #tpu.memory_space<vmem>>, vector<1x1xf32>
    %15 = vector.broadcast %14 : vector<1x1xf32> to vector<2x8xf32>
    %16 = arith.addf %13, %15 : vector<2x8xf32>
    %cst_12 = arith.constant dense<0xFF800000> : vector<2xf32>
    %17 = vector.multi_reduction <maximumf>, %16, %cst_12 [1] : vector<2x8xf32> to vector<2xf32>
    %18 = vector.shape_cast %17 : vector<2xf32> to vector<2x1xf32>
    %19 = vector.broadcast %18 : vector<2x1xf32> to vector<2x8xf32>
    %20 = arith.subf %16, %19 : vector<2x8xf32>
    %21 = math.exp %20 : vector<2x8xf32>
    %cst_13 = arith.constant dense<0.000000e+00> : vector<2xf32>
    %22 = vector.multi_reduction <add>, %21, %cst_13 [1] : vector<2x8xf32> to vector<2xf32>
    %23 = vector.shape_cast %22 : vector<2xf32> to vector<2x1xf32>
    %24 = vector.broadcast %23 : vector<2x1xf32> to vector<2x8xf32>
    %25 = arith.divf %21, %24 : vector<2x8xf32>
    %c0_14 = arith.constant 0 : index
    %c0_15 = arith.constant 0 : index
    %26 = vector.load %arg6[%c0_14, %c0_15] : memref<2x8xf32, #tpu.memory_space<vmem>>, vector<2x8xf32>
    tpu.vector_store %arg6[%c0_14, %c0_15], %25 {strides = array<i32>} : memref<2x8xf32, #tpu.memory_space<vmem>>, vector<2x8xf32>,
    return
  }
  func.func @transform_0(%arg0: i32) -> (i32, i32, i32) {
    %c0_i32 = arith.constant 0 : i32
    %c0_i32_0 = arith.constant 0 : i32
    %c0_i32_1 = arith.constant 0 : i32
    %c0_i32_2 = arith.constant 0 : i32
    return %c0_i32, %c0_i32_0, %c0_i32_1 : i32, i32, i32
  }
  func.func @transform_1(%arg0: i32) -> (i32, i32) {
    %c0_i32 = arith.constant 0 : i32
    %c0_i32_0 = arith.constant 0 : i32
    %c0_i32_1 = arith.constant 0 : i32
    return %c0_i32, %c0_i32_0 : i32, i32
  }
  func.func @transform_2(%arg0: i32) -> (i32, i32) {
    %c0_i32 = arith.constant 0 : i32
    %c0_i32_0 = arith.constant 0 : i32
    %c0_i32_1 = arith.constant 0 : i32
    return %c0_i32, %c0_i32_0 : i32, i32
  }
  func.func @transform_3(%arg0: i32) -> (i32, i32) {
    %c0_i32 = arith.constant 0 : i32
    %c0_i32_0 = arith.constant 0 : i32
    %c0_i32_1 = arith.constant 0 : i32
    return %c0_i32, %c0_i32_0 : i32, i32
  }
  func.func @transform_4(%arg0: i32) -> (i32, i32) {
    %c0_i32 = arith.constant 0 : i32
    %c0_i32_0 = arith.constant 0 : i32
    %c0_i32_1 = arith.constant 0 : i32
    return %c0_i32, %c0_i32_0 : i32, i32
  }
  func.func @transform_5(%arg0: i32) -> (i32, i32) {
    %c0_i32 = arith.constant 0 : i32
    %c0_i32_0 = arith.constant 0 : i32
    %c0_i32_1 = arith.constant 0 : i32
    return %c0_i32, %c0_i32_0 : i32, i32
  }
}

</mosaic_0001>

<bundles_post_ra>
// kernel: tpu_custom_call.1
= control target key start
LH: loop header
LB: loop body
LE: loop exit
PB: predicated region body
PF: predicated region fallthrough
CT: control target
= control target key end

     0   :  { %s488_s0 = inlined_call_operand.hbm [shape: f32[2,8,32], index: 0, kind: input, shape index: {}]   ;;  %s489_s1 = inlined_call_operand.hbm [shape: f32[32,64], index: 1, kind: input, shape index: {}]   ;;  %s490_s2 = inlined_call_operand.vmem [shape: f32[1,64], index: 2, kind: input, shape index: {}]   ;;  %s491_s3 = inlined_call_operand.vmem [shape: f32[1,64], index: 3, kind: input, shape index: {}]   ;;  %s492_s4 = inlined_call_operand.<no memory space> [shape: f32[1,1], index: 4, kind: input, shape index: {}]   ;;  %s493_s5 = inlined_call_operand.hbm [shape: f32[2,8], index: 5, kind: output, shape index: {}]  }
   0x1   :  { %v10_v0 = vstv %s492_s4 }
   0x2   :  { %11 = vst [vmem:[#allocation2] sm:$0x1] %v10_v0 }
   0x3   :  { %12 = vsyncpa [#allocation4], 0 }
   0x4   :  { %13 = vsyncpa [#allocation7], 0 }
   0x5   :  { %14 = vsyncpa [#allocation5], 0  ;;  %s401_s20 = smov [#allocation3]   ;;  %s329_s24 = scalar_lea.hbm %s488_s0, 256 }
   0x6   :  { %s20_s21 = sshll.u32 %s401_s20, 4  ;;  %p330_p0 = scmp.ne.s32.totalorder %s488_s0, %s329_s24  ;;  %s21_s21 = int_to_ptr.vmem [resolvable:$true] %s20_s21 }
   0x7   :  { %p333_p1 = scmp.lt.u32.totalorder %s329_s24, %s488_s0 }
   0x9   :  { %p335_p2 = pnand %p333_p1, %p330_p0 }
   0xb   :  { %338 = shalt.err (!%p335_p2)
}
   0xc   :  { %s339_s4 = scalar_lea.vmem %s21_s21, 256  ;;  %p344_p4 = scmp.lt.s32.totalorder %s21_s21, %s21_s21 }
   0xd   :  { %p340_p3 = scmp.ne.s32.totalorder %s21_s21, %s339_s4  ;;  %p345_p5 = scmp.lt.s32.totalorder %s339_s4, %s339_s4 }
   0xf   :  { %p346_p6 = por %p345_p5, %p344_p4 }
  0x11   :  { %p347_p7 = pnand %p346_p6, %p340_p3 }
  0x13   :  { %350 = shalt.err (!%p347_p7)
}
  0x14   :  { %s402_s29 = smov 128   ;;  %s403_s30 = smov 8  }
  0x15   :  { %26 = dma.hbm_to_vmem [thread:$0]  %s488_s0, 256, %s21_s21, [#allocation4], %s402_s29, %s402_s29, %s403_s30  }
  0x16   :  { %s404_s8 = smov [#allocation6]   ;;  %s351_s12 = scalar_lea.hbm %s489_s1, 512 }
  0x17   :  { %s32_s9 = sshll.u32 %s404_s8, 4  ;;  %p352_p8 = scmp.ne.s32.totalorder %s489_s1, %s351_s12  ;;  %s33_s9 = int_to_ptr.vmem [resolvable:$true] %s32_s9 }
  0x18   :  { %p355_p9 = scmp.lt.u32.totalorder %s351_s12, %s489_s1 }
  0x1a   :  { %p357_p10 = pnand %p355_p9, %p352_p8 }
  0x1c   :  { %360 = shalt.err (!%p357_p10)
}
  0x1d   :  { %s361_s17 = scalar_lea.vmem %s33_s9, 512  ;;  %p366_p12 = scmp.lt.s32.totalorder %s33_s9, %s33_s9 }
  0x1e   :  { %p362_p11 = scmp.ne.s32.totalorder %s33_s9, %s361_s17  ;;  %p367_p13 = scmp.lt.s32.totalorder %s361_s17, %s361_s17 }
  0x20   :  { %p368_p0 = por %p367_p13, %p366_p12 }
  0x22   :  { %p369_p1 = pnand %p368_p0, %p362_p11 }
  0x24   :  { %372 = shalt.err (!%p369_p1)
}
  0x25   :  { %38 = dma.hbm_to_vmem [thread:$0]  %s489_s1, 512, %s33_s9, [#allocation7], %s402_s29, %s402_s29, %s403_s30  }
  0x26   :  { %395 = dma.done.wait [#allocation4], 256  }
  0x27   :  { %396 = vsyncadd [#allocation4], 4294967040 }
  0x28   :  { %397 = dma.done.wait [#allocation7], 512  }
  0x29   :  { %398 = vsyncadd [#allocation7], 4294966784  ;;  %vm64_vm0 = vcmask 261120   ;;  %v53_v1 = vld [vmem:[#allocation6] sm:$0xff]  ;;  %v54_v2 = vld [vmem:[#allocation6 + $0x8] sm:$0xff]  ;;  %v405_v10 = vmov 0   ;;  %v178_v23 = vlaneseq }
  0x2a   :  { %v55_v3 = vld [vmem:[#allocation6 + $0x10] sm:$0xff]  ;;  %v305_v4 = vpack.c.bf16 %v54_v2, %v53_v1  ;;  %v56_v5 = vld [vmem:[#allocation6 + $0x18] sm:$0xff]  ;;  %v287_v9 = vld [vmem:[#allocation2] ss:$0 sm:$0xff]  ;;  %319 = vset.pattern.permute.xlu1 %v405_v10  ;;  %320 = vset.pattern.permute.xlu0 %v405_v10  ;;  %vm157_vm1 = vcmask 523264   ;;  %vm188_vm2 = vcmask 1041409  }
  0x2b   :  { %v51_v6 = vld [vmem:[#allocation3] sm:$0xff]  ;;  %v309_v7 = vpack.c.bf16 %v56_v5, %v55_v3  ;;  %v52_v8 = vld [vmem:[#allocation3 + $0x8] sm:$0xff]  ;;  %171 = vperm.xlu1 %319, %v287_v9   ;;  %v283_v11 = vld [vmem:[%s490_s2] ss:$0 sm:$0xff]  ;;  %v179_v24 = vand.u32 127, %v178_v23  ;;  %v181_v25 = vshrl.u32 %v178_v23, 7 }
  0x2c   :  { %302 = vmatprep.mubr.msk.f32.mxu0 %vm64_vm0, %v51_v6  ;;  %306 = vmatprep.subr.bf16.mxu0 %v305_v4  ;;  %v286_v16 = vld [vmem:[%s491_s3] ss:$0 sm:$0xff]  ;;  %vm191_vm3 = vcmask 58368   ;;  %s406_s2 = smov [#allocation8]  }
  0x2d   :  { %308 = vmatpush3.bf16.msra.mxu0 %v305_v4  ;;  %v182_v28 = vsub.s32 %v179_v24, %v181_v25  ;;  %v198_v36 = vsub.s32 0, %v181_v25  ;;  %v202_v37 = vsub.s32 1, %v181_v25  ;;  %s273_s3 = sshll.u32 %s406_s2, 4  ;;  %s274_s3 = int_to_ptr.vmem [resolvable:$true] %s273_s3 }
  0x2e   :  { %310 = vmatprep.subr.bf16.mxu0 %v309_v7  ;;  %s373_s22 = scalar_lea.vmem %s274_s3, 32  ;;  %p378_p3 = scmp.lt.s32.totalorder %s274_s3, %s274_s3 }
  0x2f   :  { %p374_p2 = scmp.ne.s32.totalorder %s274_s3, %s373_s22  ;;  %p379_p4 = scmp.lt.s32.totalorder %s373_s22, %s373_s22 }
  0x31   :  { %312 = vmatpush3.bf16.msra.mxu0 %v309_v7  ;;  %p380_p5 = por %p379_p4, %p378_p3 }
  0x33   :  { %p381_p6 = pnand %p380_p5, %p374_p2 }
  0x34   :  { %303 = vmatmul.mubr.msk.f32.vlgmr.msra.gmra.mrb[0].mxu0 %vm64_vm0, %v52_v8 }
  0xaa   :  { %v172_v26 = vpop.permute.xlu1 %171 }
 0x107   :  { %v304_v12 = vpop.f32.mrb[0].mxu0 }
 0x108   :  { %v143_v13 = vadd.f32 %v304_v12, %v283_v11  ;;  %v137_v14 = vpop.f32.mrb[1].mxu0 }
 0x109   :  { %v138_v15 = vadd.f32 %v283_v11, %v137_v14 }
 0x10a   :  { %v147_v17 = vmax.f32 %v143_v13, 0.0 }
 0x10b   :  { %v146_v18 = vmax.f32 %v138_v15, 0.0 }
 0x10c   :  { %v156_v21 = vmul.f32 %v286_v16, %v147_v17 }
 0x10d   :  { %v155_v19 = vmul.f32 %v286_v16, %v146_v18 }
 0x10e   :  { %v161_v22 = vsel %vm157_vm1, %v156_v21, 0.0 }
 0x10f   :  { %v158_v20 = vsel %vm157_vm1, %v155_v19, 0.0 }
 0x110   :  { %159 = vadd.xlane.f32.xlu0 %v158_v20 }
 0x114   :  { %162 = vadd.xlane.f32.xlu0 %v161_v22 }
 0x19d   :  { %v160_v27 = vpop.xlane.xlu0 %159 }
 0x19e   :  { %v174_v29 = vadd.f32 %v172_v26, %v160_v27 }
 0x1a0   :  { %v183_v32 = vrot.slane %v174_v29, %v182_v28 }
 0x1a1   :  { %v163_v30 = vpop.xlane.xlu0 %162 }
 0x1a2   :  { %v175_v31 = vadd.f32 %v172_v26, %v163_v30 }
 0x1a4   :  { %v187_v33 = vrot.slane %v175_v31, %v182_v28 }
 0x1a6   :  { %v189_v34 = vsel %vm188_vm2, %v187_v33, %v183_v32 }
 0x1a7   :  { %v192_v35 = vsel %vm191_vm3, %v189_v34, -inf }
 0x1a8   :  { %193 = vmax.xlane.f32.xlu1 %v192_v35 }
 0x235   :  { %v194_v38 = vpop.xlane.xlu1 %193 }
 0x236   :  { %v199_v39 = vrot.slane %v194_v38, %v198_v36  ;;  %v203_v40 = vrot.slane %v194_v38, %v202_v37 }
 0x238   :  { %v206_v41 = vsub.f32 %v174_v29, %v199_v39  ;;  %v207_v42 = vsub.f32 %v175_v31, %v203_v40 }
 0x23a   :  { %v208_v43 = vmul.f32 1.442695, %v206_v41  ;;  %v210_v44 = vmul.f32 1.442695, %v207_v42 }
 0x23c   :  { %321 = vpow2.f32 %v208_v43 }
 0x23d   :  { %323 = vpow2.f32 %v210_v44 }
 0x246   :  { %v322_v45 = vpop.eup %321 }
 0x247   :  { %v324_v46 = vpop.eup %323  ;;  %215 = vperm.xlu0 %320, %v322_v45  }
 0x248   :  { %218 = vperm.xlu1 %319, %v324_v46  }
 0x2c6   :  { %v216_v47 = vpop.permute.xlu0 %215 }
 0x2c7   :  { %v219_v48 = vpop.permute.xlu1 %218  ;;  %v223_v49 = vrot.slane %v216_v47, %v182_v28 }
 0x2c8   :  { %v227_v50 = vrot.slane %v219_v48, %v182_v28 }
 0x2ca   :  { %v228_v51 = vsel %vm188_vm2, %v227_v50, %v223_v49 }
 0x2cb   :  { %v230_v52 = vsel %vm191_vm3, %v228_v51, 0.0 }
 0x2cc   :  { %231 = vadd.xlane.f32.xlu0 %v230_v52 }
 0x359   :  { %v232_v53 = vpop.xlane.xlu0 %231 }
 0x35a   :  { %v237_v54 = vrot.slane %v232_v53, %v198_v36  ;;  %v241_v55 = vrot.slane %v232_v53, %v202_v37 }
 0x35c   :  { %325 = vrcp.f32 %v237_v54 }
 0x35d   :  { %327 = vrcp.f32 %v241_v55 }
 0x366   :  { %v326_v56 = vpop.eup %325 }
 0x367   :  { %v245_v57 = vmul.f32 %v326_v56, %v322_v45  ;;  %v328_v58 = vpop.eup %327 }
 0x368   :  { %v247_v59 = vmul.f32 %v328_v58, %v324_v46 }
 0x369   :  { %251 = vperm.xlu1 %319, %v245_v57  }
 0x36d   :  { %254 = vperm.xlu1 %319, %v247_v59  }
 0x3e8   :  { %v252_v60 = vpop.permute.xlu1 %251 }
 0x3e9   :  { %v259_v62 = vrot.slane %v252_v60, %v182_v28 }
 0x3ec   :  { %v255_v61 = vpop.permute.xlu1 %254 }
 0x3ed   :  { %v263_v63 = vrot.slane %v255_v61, %v182_v28 }
 0x3ef   :  { %v264_v0 = vsel %vm188_vm2, %v263_v63, %v259_v62 }
 0x3f0   :  { %266 = vst.msk [vmem:[#allocation8] sm:$0x3] %vm191_vm3, %v264_v0 }
 0x3f1   :  { %384 = shalt.err (!%p381_p6)
}
 0x3f2   :  { %s385_s25 = scalar_lea.hbm %s493_s5, 32 }
 0x3f3   :  { %p386_p7 = scmp.ne.s32.totalorder %s493_s5, %s385_s25  ;;  %p389_p8 = scmp.lt.u32.totalorder %s385_s25, %s493_s5 }
 0x3f5   :  { %p391_p9 = pnand %p389_p8, %p386_p7 }
 0x3f7   :  { %394 = shalt.err (!%p391_p9)
}
 0x3f8   :  { %276 = dma.vmem_to_hbm [thread:$0]  %s274_s3, 32, %s493_s5, [#allocation5]  }
 0x3f9   :  { %399 = dma.done.wait [#allocation5], 32  }
 0x3fa   :  { %400 = vsyncadd [#allocation5], 4294967264 }
 0x3fb   :  { %280 = vsyncpa [#allocation4], 1 }
 0x3fc   :  { %281 = vsyncpa [#allocation7], 1 }
 0x3fd   :  { %282 = vsyncpa [#allocation5], 1 }

</bundles_post_ra>
